<compile_context>
chip_gen: v6e
topology: v6e:2x2x1
jax: 0.10.0
libtpu: 0.0.40
codegen_flags: <defaults>
</compile_context>

<pallas_src>
import math

import jax
import jax.numpy as jnp
from jax import lax
from jax.experimental import pallas as pl
from jax.experimental.pallas import tpu as pltpu

_INV_SQRT2 = 1.0 / math.sqrt(2.0)


def _ffn_kernel(x_ref, w1_ref, b1_ref, w2_ref, b2_ref, o_ref, acc_ref):
    k = pl.program_id(1)

    @pl.when(k == 0)
    def _init():
        # Fold the second bias into the accumulator init: saves a VPU pass and
        # a VMEM round-trip over the (TM, dp) accumulator per M tile.
        acc_ref[...] = jnp.broadcast_to(
            b2_ref[...].astype(jnp.float32), acc_ref.shape)

    # First linear, this hidden chunk only: [TM, dp] @ [dp, TH], f32 acc on MXU.
    h = jnp.dot(x_ref[...], w1_ref[...], preferred_element_type=jnp.float32)
    h += b1_ref[...]                                    # (1, TH) broadcast
    # Exact GELU (erf form) -> matches PyTorch nn.GELU() default.
    h = 0.5 * h * (1.0 + lax.erf(h * _INV_SQRT2))
    # Second matmul input in the activation dtype (bf16 MXU path for bf16
    # callers; no-op for f32), still accumulating in f32.
    h = h.astype(x_ref.dtype)
    acc_ref[...] += jnp.dot(h, w2_ref[...], preferred_element_type=jnp.float32)

    @pl.when(k == pl.num_programs(1) - 1)
    def _finalize():
        o_ref[...] = acc_ref[...].astype(o_ref.dtype)


def _round_up(v, m):
    return (v + m - 1) // m * m


def _vmem_capacity_bytes():
    """Per-generation VMEM capacity (128 MiB v5e/v6e, 64 MiB/core v7x)."""
    try:
        cap = getattr(pltpu.get_tpu_info(), "vmem_capacity_bytes", None)
        if cap:
            return int(cap)
    except Exception:
        pass
    return 64 << 20  # conservative fallback (v7x per-core figure)


def feed_forward(x, w1, b1, w2, b2, *, tm_max=1024, th_max=512):
    """x: [B, S, dim]; w1: [dim, hidden]; b1: [hidden]; w2: [hidden, dim]; b2: [dim]."""
    B, S, dim = x.shape
    hidden = w1.shape[1]
    M = B * S
    itemsize = jnp.dtype(x.dtype).itemsize

    # ---- dim (lane) handling: pad only when actually misaligned. Small dims
    # (< 128) use full-extent blocks, which Pallas allows without padding.
    if dim % 128 == 0 or dim < 128:
        dp = dim
    else:
        dp = _round_up(dim, 128)

    # ---- hidden tiling: TH is the innermost ("arbitrary") grid axis so W1/W2
    # never have to be fully VMEM-resident (critical on v7x's 64 MiB). Chunks
    # are 512/256-aligned for the v6e/v7x 2x256x256 MXU whenever possible.
    if hidden <= th_max:
        TH, hp = hidden, hidden
    elif hidden % 512 == 0:
        TH, hp = 512, hidden
    elif hidden % 256 == 0:
        TH, hp = 256, hidden
    else:
        TH = th_max
        hp = _round_up(hidden, TH)

    # Conditional padding: skip the HBM rewrite when shapes are already
    # aligned (zeros are inert: gelu(0)=0, zero rows/cols/biases add nothing).
    # TODO(synk): in a full model, pad the static weights once at load time
    # instead of inside every forward call.
    x2d = x.reshape(M, dim)
    if dp != dim:
        x2d = jnp.pad(x2d, ((0, 0), (0, dp - dim)))
    if dp != dim or hp != hidden:
        w1p = jnp.pad(w1, ((0, dp - dim), (0, hp - hidden)))
        w2p = jnp.pad(w2, ((0, hp - hidden), (0, dp - dim)))
    else:
        w1p, w2p = w1, w2
    b1p = (b1 if hp == hidden else jnp.pad(b1, (0, hp - hidden))).reshape(1, hp)
    b2p = (b2 if dp == dim else jnp.pad(b2, (0, dp - dim))).reshape(1, dp)

    # ---- TM selection against an honest, per-generation VMEM budget.
    # Every input block is counted twice (Pallas double-buffers by default,
    # including constant-index blocks such as b2).
    vmem_cap = _vmem_capacity_bytes()
    budget = int(vmem_cap * 0.80)            # headroom for Mosaic internals
    tm_cap = min(tm_max, _round_up(M, 8))    # never larger than (padded) M

    def _vmem_need(tm):
        return (
            2 * tm * dp * itemsize                 # x tiles   (double-buffered)
            + 2 * tm * dp * itemsize               # out tiles (double-buffered)
            + 2 * dp * TH * itemsize               # streamed W1 chunks
            + 2 * TH * dp * itemsize               # streamed W2 chunks
            + 2 * 8 * TH * itemsize                # b1 chunks (sublane-padded)
            + 2 * 8 * dp * itemsize                # b2 (constant, still 2x)
            + tm * dp * 4                          # f32 accumulator scratch
            + tm * TH * 4 + tm * TH * itemsize     # live f32 GELU interm. + cast
        )

    TM = 8
    for cand in (1024, 512, 256, 128, 64, 32, 16, 8):
        tm = min(cand, tm_cap)
        if _vmem_need(tm) <= budget:
            TM = tm
            break
    need = _vmem_need(TM)
    vmem_limit = min(int(vmem_cap * 0.90), max(48 << 20, 2 * need))

    grid = (pl.cdiv(M, TM), hp // TH)
    grid_m = grid[0]

    cost = pl.CostEstimate(
        flops=4 * M * dim * hidden,                 # two matmuls
        transcendentals=M * hidden,                 # erf per hidden activation
        bytes_accessed=(2 * M * dp * itemsize                       # x in, out
                        + grid_m * (dp * hp + hp * dp) * itemsize   # W re-reads per M tile
                        + (hp + dp) * itemsize),                    # biases
    )

    out2d = pl.pallas_call(
        _ffn_kernel,
        out_shape=jax.ShapeDtypeStruct((M, dp), x.dtype),
        grid=grid,
        in_specs=[
            pl.BlockSpec((TM, dp), lambda i, k: (i, 0)),   # x: streams over M, reused over k
            pl.BlockSpec((dp, TH), lambda i, k: (0, k)),   # W1 chunk: streams over hidden
            pl.BlockSpec((1, TH), lambda i, k: (0, k)),    # b1 chunk
            pl.BlockSpec((TH, dp), lambda i, k: (k, 0)),   # W2 chunk
            pl.BlockSpec((1, dp), lambda i, k: (0, 0)),    # b2 (constant block)
        ],
        out_specs=pl.BlockSpec((TM, dp), lambda i, k: (i, 0)),
        scratch_shapes=[pltpu.VMEM((TM, dp), jnp.float32)],   # f32 accumulator
        compiler_params=pltpu.CompilerParams(
            dimension_semantics=("parallel", "arbitrary"),
            vmem_limit_bytes=vmem_limit,
        ),
        cost_estimate=cost,
    )(x2d, w1p, b1p, w2p, b2p)

    if dp != dim:
        out2d = out2d[:, :dim]
    return out2d.reshape(B, S, dim)


def _reference(x, w1, b1, w2, b2):
    h = jnp.einsum("bsd,dh->bsh", x, w1) + b1
    h = jax.nn.gelu(h, approximate=False)
    return jnp.einsum("bsh,hd->bsd", h, w2) + b2


if __name__ == "__main__":
    B, S, dim, hidden_dim = 2, 8, 32, 64

    key = jax.random.PRNGKey(0)
    kx, kw1, kb1, kw2, kb2 = jax.random.split(key, 5)

    x = jax.random.normal(kx, (B, S, dim), dtype=jnp.float32)
    # Deterministic parameter init (uniform, PyTorch Linear default scale).
    bound1 = 1.0 / math.sqrt(dim)
    bound2 = 1.0 / math.sqrt(hidden_dim)
    w1 = jax.random.uniform(kw1, (dim, hidden_dim), jnp.float32, -bound1, bound1)
    b1 = jax.random.uniform(kb1, (hidden_dim,), jnp.float32, -bound1, bound1)
    w2 = jax.random.uniform(kw2, (hidden_dim, dim), jnp.float32, -bound2, bound2)
    b2 = jax.random.uniform(kb2, (dim,), jnp.float32, -bound2, bound2)

    out = feed_forward(x, w1, b1, w2, b2)
    out = jax.block_until_ready(out)

    ref = _reference(x, w1, b1, w2, b2)
    assert out.shape == (B, S, dim)
    assert jnp.allclose(out, ref, atol=1e-4, rtol=1e-4), "mismatch vs reference"

    print("KERNEL_OK")
</pallas_src>

<mosaic_0001>
module attributes {stable_mosaic.version = 11 : i64} {
  func.func @_ffn_kernel(%arg0: i32, %arg1: i32, %arg2: memref<16x32xf32, #tpu.memory_space<vmem>>, %arg3: memref<32x64xf32, #tpu.memory_space<vmem>>, %arg4: memref<1x64xf32, #tpu.memory_space<vmem>>, %arg5: memref<64x32xf32, #tpu.memory_space<vmem>>, %arg6: memref<1x32xf32, #tpu.memory_space<vmem>>, %arg7: memref<16x32xf32, #tpu.memory_space<vmem>>, %arg8: memref<16x32xf32, #tpu.memory_space<vmem>>) attributes {dimension_semantics = [#tpu.dimension_semantics<parallel>, #tpu.dimension_semantics<arbitrary>], iteration_bounds = array<i64: 1, 1>, scalar_prefetch = 0 : i64, scratch_operands = 1 : i64, tpu.core_type = #tpu.core_type<tc>, window_params = [{transform_indices = @transform_0, window_bounds = array<i64: 16, 32>}, {transform_indices = @transform_1, window_bounds = array<i64: 32, 64>}, {transform_indices = @transform_2, window_bounds = array<i64: 1, 64>}, {transform_indices = @transform_3, window_bounds = array<i64: 64, 32>}, {pipeline_mode = #tpu.pipeline_mode<synchronous>, transform_indices = @transform_4, window_bounds = array<i64: 1, 32>}, {transform_indices = @transform_5, window_bounds = array<i64: 16, 32>}]} {
    %c0_i32 = arith.constant 0 : i32
    %0 = arith.cmpi eq, %arg1, %c0_i32 : i32
    %1 = arith.extui %0 : i1 to i32
    %c0_i32_0 = arith.constant 0 : i32
    %2 = arith.cmpi ne, %1, %c0_i32_0 : i32
    scf.if %2 {
      %c0_18 = arith.constant 0 : index
      %c0_19 = arith.constant 0 : index
      %25 = vector.load %arg6[%c0_18, %c0_19] : memref<1x32xf32, #tpu.memory_space<vmem>>, vector<1x32xf32>
      %26 = vector.shape_cast %25 : vector<1x32xf32> to vector<1x32xf32>
      %27 = vector.broadcast %26 : vector<1x32xf32> to vector<16x32xf32>
      %c0_20 = arith.constant 0 : index
      %c0_21 = arith.constant 0 : index
      %28 = vector.load %arg8[%c0_20, %c0_21] : memref<16x32xf32, #tpu.memory_space<vmem>>, vector<16x32xf32>
      tpu.vector_store %arg8[%c0_20, %c0_21], %27 {strides = array<i32>} : memref<16x32xf32, #tpu.memory_space<vmem>>, vector<16x32xf32>,
    } else {
    }
    %c0 = arith.constant 0 : index
    %c0_1 = arith.constant 0 : index
    %3 = vector.load %arg2[%c0, %c0_1] : memref<16x32xf32, #tpu.memory_space<vmem>>, vector<16x32xf32>
    %c0_2 = arith.constant 0 : index
    %c0_3 = arith.constant 0 : index
    %4 = vector.load %arg3[%c0_2, %c0_3] : memref<32x64xf32, #tpu.memory_space<vmem>>, vector<32x64xf32>
    %cst = arith.constant dense<0.000000e+00> : vector<16x64xf32>
    %5 = tpu.matmul %3, %4, %cst {dimension_numbers = #tpu.dot_dimension_numbers<[1], [0], [0], [1], [0, 0, 1, 1], [], []>} : vector<16x32xf32>, vector<32x64xf32>, vector<16x64xf32> -> vector<16x64xf32>
    %c0_4 = arith.constant 0 : index
    %c0_5 = arith.constant 0 : index
    %6 = vector.load %arg4[%c0_4, %c0_5] : memref<1x64xf32, #tpu.memory_space<vmem>>, vector<1x64xf32>
    %7 = vector.broadcast %6 : vector<1x64xf32> to vector<16x64xf32>
    %8 = arith.addf %5, %7 : vector<16x64xf32>
    %cst_6 = arith.constant 5.000000e-01 : f32
    %9 = vector.broadcast %cst_6 : f32 to vector<16x64xf32>
    %10 = arith.mulf %9, %8 : vector<16x64xf32>
    %cst_7 = arith.constant 0.707106769 : f32
    %11 = vector.broadcast %cst_7 : f32 to vector<16x64xf32>
    %12 = arith.mulf %8, %11 : vector<16x64xf32>
    %13 = math.erf %12 : vector<16x64xf32>
    %cst_8 = arith.constant 1.000000e+00 : f32
    %14 = vector.broadcast %cst_8 : f32 to vector<16x64xf32>
    %15 = arith.addf %14, %13 : vector<16x64xf32>
    %16 = arith.mulf %10, %15 : vector<16x64xf32>
    %c0_9 = arith.constant 0 : index
    %c0_10 = arith.constant 0 : index
    %17 = vector.load %arg8[%c0_9, %c0_10] : memref<16x32xf32, #tpu.memory_space<vmem>>, vector<16x32xf32>
    %c0_11 = arith.constant 0 : index
    %c0_12 = arith.constant 0 : index
    %18 = vector.load %arg5[%c0_11, %c0_12] : memref<64x32xf32, #tpu.memory_space<vmem>>, vector<64x32xf32>
    %cst_13 = arith.constant dense<0.000000e+00> : vector<16x32xf32>
    %19 = tpu.matmul %16, %18, %cst_13 {dimension_numbers = #tpu.dot_dimension_numbers<[1], [0], [0], [1], [0, 0, 1, 1], [], []>} : vector<16x64xf32>, vector<64x32xf32>, vector<16x32xf32> -> vector<16x32xf32>
    %20 = arith.addf %17, %19 : vector<16x32xf32>
    %c0_14 = arith.constant 0 : index
    %c0_15 = arith.constant 0 : index
    %21 = vector.load %arg8[%c0_14, %c0_15] : memref<16x32xf32, #tpu.memory_space<vmem>>, vector<16x32xf32>
    tpu.vector_store %arg8[%c0_14, %c0_15], %20 {strides = array<i32>} : memref<16x32xf32, #tpu.memory_space<vmem>>, vector<16x32xf32>,
    %c0_i32_16 = arith.constant 0 : i32
    %22 = arith.cmpi eq, %arg1, %c0_i32_16 : i32
    %23 = arith.extui %22 : i1 to i32
    %c0_i32_17 = arith.constant 0 : i32
    %24 = arith.cmpi ne, %23, %c0_i32_17 : i32
    scf.if %24 {
      %c0_18 = arith.constant 0 : index
      %c0_19 = arith.constant 0 : index
      %25 = vector.load %arg8[%c0_18, %c0_19] : memref<16x32xf32, #tpu.memory_space<vmem>>, vector<16x32xf32>
      %c0_20 = arith.constant 0 : index
      %c0_21 = arith.constant 0 : index
      %26 = vector.load %arg7[%c0_20, %c0_21] : memref<16x32xf32, #tpu.memory_space<vmem>>, vector<16x32xf32>
      tpu.vector_store %arg7[%c0_20, %c0_21], %25 {strides = array<i32>} : memref<16x32xf32, #tpu.memory_space<vmem>>, vector<16x32xf32>,
    } else {
    }
    return
  }
  func.func @transform_0(%arg0: i32, %arg1: i32) -> (i32, i32) {
    %c0_i32 = arith.constant 0 : i32
    %c0_i32_0 = arith.constant 0 : i32
    return %arg0, %c0_i32 : i32, i32
  }
  func.func @transform_1(%arg0: i32, %arg1: i32) -> (i32, i32) {
    %c0_i32 = arith.constant 0 : i32
    %c0_i32_0 = arith.constant 0 : i32
    return %c0_i32, %arg1 : i32, i32
  }
  func.func @transform_2(%arg0: i32, %arg1: i32) -> (i32, i32) {
    %c0_i32 = arith.constant 0 : i32
    %c0_i32_0 = arith.constant 0 : i32
    return %c0_i32, %arg1 : i32, i32
  }
  func.func @transform_3(%arg0: i32, %arg1: i32) -> (i32, i32) {
    %c0_i32 = arith.constant 0 : i32
    %c0_i32_0 = arith.constant 0 : i32
    return %arg1, %c0_i32 : i32, i32
  }
  func.func @transform_4(%arg0: i32, %arg1: i32) -> (i32, i32) {
    %c0_i32 = arith.constant 0 : i32
    %c0_i32_0 = arith.constant 0 : i32
    %c0_i32_1 = arith.constant 0 : i32
    return %c0_i32, %c0_i32_0 : i32, i32
  }
  func.func @transform_5(%arg0: i32, %arg1: i32) -> (i32, i32) {
    %c0_i32 = arith.constant 0 : i32
    %c0_i32_0 = arith.constant 0 : i32
    return %arg0, %c0_i32 : i32, i32
  }
}

</mosaic_0001>

<bundles_post_ra>
// kernel: tpu_custom_call.1
= control target key start
LH: loop header
LB: loop body
LE: loop exit
PB: predicated region body
PF: predicated region fallthrough
CT: control target
= control target key end

     0   :  { %vm32_vm0 = vcmask 261120   ;;  %s432_s0 = inlined_call_operand.vmem [shape: f32[16,32], index: 0, kind: input, shape index: {}]   ;;  %s433_s1 = inlined_call_operand.vmem [shape: f32[32,64], index: 1, kind: input, shape index: {}]   ;;  %s434_s2 = inlined_call_operand.vmem [shape: f32[1,64], index: 2, kind: input, shape index: {}]   ;;  %s435_s3 = inlined_call_operand.vmem [shape: f32[64,32], index: 3, kind: input, shape index: {}]   ;;  %s436_s4 = inlined_call_operand.vmem [shape: f32[1,32], index: 4, kind: input, shape index: {}]   ;;  %s437_s5 = inlined_call_operand.hbm [shape: f32[16,32], index: 5, kind: output, shape index: {}]  }
   0x1   :  { %v40_v0 = vld [vmem:[%s433_s1 + $0x18] sm:$0xff]  ;;  %v39_v1 = vld [vmem:[%s433_s1 + $0x10] sm:$0xff]  ;;  %v35_v2 = vld [vmem:[%s432_s0] sm:$0xff] }
   0x2   :  { %281 = vmatprep.subr.mxu0 %v40_v0  ;;  %v38_v3 = vld [vmem:[%s433_s1 + $0x8] sm:$0xff]  ;;  %289 = vmatprep.mubr.msk.f32.mxu0 %vm32_vm0, %v35_v2 }
   0x3   :  { %282 = vmatpush3.msra.mxu0 %v40_v0 }
   0x4   :  { %10 = vsyncpa [#allocation4], 0  ;;  %283 = vmatprep.subr.mxu0 %v39_v1  ;;  %v37_v4 = vld [vmem:[%s433_s1] sm:$0xff]  ;;  %v36_v5 = vld [vmem:[%s432_s0 + $0x8] sm:$0xff]  ;;  %vm150_vm1 = vcmask 523264  }
   0x5   :  { %284 = vmatpush3.msra.mxu0 %v39_v1  ;;  %v149_v6 = vld [vmem:[%s435_s3 + $0x38] sm:$0xff]  ;;  %v148_v7 = vld [vmem:[%s435_s3 + $0x30] sm:$0xff]  ;;  %v147_v8 = vld [vmem:[%s435_s3 + $0x28] sm:$0xff] }
   0x6   :  { %285 = vmatprep.subr.mxu0 %v38_v3  ;;  %292 = vmatprep.subr.mxu1 %v149_v6  ;;  %v146_v9 = vld [vmem:[%s435_s3 + $0x20] sm:$0xff]  ;;  %v145_v10 = vld [vmem:[%s435_s3 + $0x18] sm:$0xff]  ;;  %v144_v11 = vld [vmem:[%s435_s3 + $0x10] sm:$0xff] }
   0x7   :  { %286 = vmatpush3.msra.mxu0 %v38_v3  ;;  %293 = vmatpush3.msra.mxu1 %v149_v6  ;;  %v143_v12 = vld [vmem:[%s435_s3 + $0x8] sm:$0xff]  ;;  %v142_v13 = vld [vmem:[%s435_s3] sm:$0xff] }
   0x8   :  { %287 = vmatprep.subr.mxu0 %v37_v4  ;;  %294 = vmatprep.subr.mxu1 %v148_v7  ;;  %v259_v14 = vld [vmem:[%s436_s4] ss:$0 sm:$0xff] }
   0x9   :  { %288 = vmatpush3.msra.mxu0 %v37_v4  ;;  %295 = vmatpush3.msra.mxu1 %v148_v7  ;;  %34 = vst.msk [vmem:[#allocation2 + $0x8] sm:$0xff] %vm32_vm0, %v259_v14  ;;  %33 = vst.msk [vmem:[#allocation2] sm:$0xff] %vm32_vm0, %v259_v14  ;;  %v260_v15 = vld [vmem:[%s434_s2] ss:$0 sm:$0xff]  ;;  %s340_s2 = smov [#allocation3]  }
   0xa   :  { %290 = vmatmul.mubr.msk.f32.vlgmr.msra.gmra.mxu0 %vm32_vm0, %v36_v5  ;;  %296 = vmatprep.subr.mxu1 %v147_v8  ;;  %s248_s3 = sshll.u32 %s340_s2, 4  ;;  %s249_s3 = int_to_ptr.vmem [resolvable:$true] %s248_s3 }
   0xb   :  { %297 = vmatpush3.msra.mxu1 %v147_v8  ;;  %s318_s4 = scalar_lea.vmem %s249_s3, 256  ;;  %p323_p1 = scmp.lt.s32.totalorder %s249_s3, %s249_s3 }
   0xc   :  { %298 = vmatprep.subr.mxu1 %v146_v9  ;;  %p319_p0 = scmp.ne.s32.totalorder %s249_s3, %s318_s4  ;;  %p324_p2 = scmp.lt.s32.totalorder %s318_s4, %s318_s4 }
   0xd   :  { %299 = vmatpush3.msra.mxu1 %v146_v9 }
   0xe   :  { %300 = vmatprep.subr.mxu1 %v145_v10  ;;  %p325_p3 = por %p324_p2, %p323_p1 }
   0xf   :  { %301 = vmatpush3.msra.mxu1 %v145_v10 }
  0x10   :  { %302 = vmatprep.subr.mxu1 %v144_v11  ;;  %v141_v30 = vld [vmem:[#allocation2 + $0x8] sm:$0xff]  ;;  %v140_v32 = vld [vmem:[#allocation2] sm:$0xff]  ;;  %p326_p4 = pnand %p325_p3, %p319_p0 }
  0x11   :  { %303 = vmatpush3.msra.mxu1 %v144_v11 }
  0x12   :  { %304 = vmatprep.subr.mxu1 %v143_v12 }
  0x13   :  { %305 = vmatpush3.msra.mxu1 %v143_v12 }
  0x14   :  { %306 = vmatprep.subr.mxu1 %v142_v13 }
  0x15   :  { %307 = vmatpush3.msra.mxu1 %v142_v13 }
  0xca   :  { %v291_v16 = vpop.f32.mrf.mxu0 }
  0xcb   :  { %v127_v17 = vadd.f32 %v291_v16, %v260_v15 }
  0xcc   :  { %v121_v18 = vpop.f32.mrf.mxu0 }
  0xcd   :  { %v133_v19 = vmul.f32 0.70710677, %v127_v17  ;;  %v122_v20 = vadd.f32 %v260_v15, %v121_v18  ;;  %v131_v27 = vmul.f32 0.5, %v127_v17 }
  0xcf   :  { %314 = verf.f32 %v133_v19  ;;  %v132_v21 = vmul.f32 0.70710677, %v122_v20  ;;  %v130_v25 = vmul.f32 0.5, %v122_v20 }
  0xd1   :  { %316 = verf.f32 %v132_v21 }
  0xdc   :  { %v315_v22 = vpop.eup %314 }
  0xdd   :  { %v137_v24 = vadd.f32 1.0, %v315_v22 }
  0xde   :  { %v317_v23 = vpop.eup %316 }
  0xdf   :  { %v136_v26 = vadd.f32 1.0, %v317_v23  ;;  %v139_v29 = vmul.f32 %v137_v24, %v131_v27 }
  0xe1   :  { %v138_v28 = vmul.f32 %v136_v26, %v130_v25 }
  0xe3   :  { %308 = vmatprep.mubr.msk.f32.mxu1 %vm150_vm1, %v138_v28 }
  0xe4   :  { %309 = vmatmul.mubr.msk.f32.vlgmr.msra.gmra.mxu1 %vm150_vm1, %v139_v29 }
 0x1a4   :  { %v310_v31 = vpop.f32.mrf.mxu1 }
 0x1a5   :  { %v233_v33 = vadd.f32 %v310_v31, %v141_v30 }
 0x1a6   :  { %v223_v34 = vpop.f32.mrf.mxu1 }
 0x1a7   :  { %235 = vst.msk [vmem:[#allocation2 + $0x8] sm:$0xff] %vm32_vm0, %v233_v33  ;;  %v232_v35 = vadd.f32 %v223_v34, %v140_v32 }
 0x1a9   :  { %234 = vst.msk [vmem:[#allocation2] sm:$0xff] %vm32_vm0, %v232_v35 }
 0x1ae   :  { %v240_v36 = vld [vmem:[#allocation2 + $0x8] sm:$0xff] }
 0x1af   :  { %242 = vst.msk [vmem:[#allocation3 + $0x8] sm:$0xff] %vm32_vm0, %v240_v36 }
 0x1b0   :  { %v239_v37 = vld [vmem:[#allocation2] sm:$0xff] }
 0x1b1   :  { %241 = vst.msk [vmem:[#allocation3] sm:$0xff] %vm32_vm0, %v239_v37 }
 0x1b2   :  { %329 = shalt.err (!%p326_p4)
}
 0x1b3   :  { %s341_s23 = smov 128   ;;  %s342_s24 = smov 8  }
 0x1b4   :  { %254 = dma.vmem_to_hbm [thread:$0]  %s249_s3, 256, %s437_s5, [#allocation4], %s341_s23, %s341_s23, %s342_s24  }
 0x1b5   :  { %338 = dma.done.wait [#allocation4], 256  }
 0x1b6   :  { %339 = vsyncadd [#allocation4], 4294967040 }
 0x1b7   :  { %258 = vsyncpa [#allocation4], 1 }

</bundles_post_ra>
